<compile_context>
chip_gen: v6e
topology: v6e:2x2x1
jax: 0.10.0
libtpu: 0.0.40
codegen_flags: <defaults>
</compile_context>

<pallas_src>
import functools

import jax
import jax.numpy as jnp
import numpy as np
from jax import lax
from jax.experimental import pallas as pl
from jax.experimental.pallas import tpu as pltpu

_LANES = 128   # vreg lane count
_SUB = 8       # vreg sublane count


def _region_kernel(p_ref, l_ref, out_ref):
    # p_ref, l_ref : (BR, 128) f32 tiles
    # out_ref      : (1, 2, 8, 128) f32 per-block partial sums
    p = p_ref[...]
    lab = l_ref[...]

    lm1 = lab - 1.0
    t_in = p * lm1 * lm1                 # prediction * (label - 1)^2
    t_out = (1.0 - p) * lab * lab        # (1 - prediction) * label^2

    br = p.shape[0]
    # Reduce across vreg groups with plain VPU adds: the reshape splits the
    # sublane axis into (groups, 8) — no data movement, no XLU.
    pin = jnp.sum(t_in.reshape(br // _SUB, _SUB, _LANES), axis=0)    # (8,128)
    pout = jnp.sum(t_out.reshape(br // _SUB, _SUB, _LANES), axis=0)  # (8,128)

    out_ref[0, 0, :, :] = pin
    out_ref[0, 1, :, :] = pout


@functools.partial(jax.jit, static_argnames=("miu", "block_rows"))
def acloss_pallas(prediction, label, *, miu=1.0, block_rows=1024):
    """prediction, label: float NCHW arrays.  Returns scalar f32 loss."""
    pred = prediction.astype(jnp.float32).reshape(-1)
    lab = label.astype(jnp.float32).reshape(-1)
    total = pred.shape[0]

    # Lane-dense layout: view the flat data as (rows, 128).
    rows = -(-total // _LANES)
    br = min(int(block_rows), max(rows, _SUB))
    br = ((br + _SUB - 1) // _SUB) * _SUB          # sublane-aligned block rows
    rows_p = ((rows + br - 1) // br) * br          # pad rows to block multiple
    grid = rows_p // br

    pad = rows_p * _LANES - total
    if pad:
        # Zero padding contributes 0 to both region terms
        # (0*(0-1)^2 == 0 and (1-0)*0^2 == 0), so the result is unchanged.
        pred = jnp.pad(pred, (0, pad))
        lab = jnp.pad(lab, (0, pad))
    pred2 = pred.reshape(rows_p, _LANES)
    lab2 = lab.reshape(rows_p, _LANES)

    partials = pl.pallas_call(
        _region_kernel,
        out_shape=jax.ShapeDtypeStruct((grid, 2, _SUB, _LANES), jnp.float32),
        grid_spec=pltpu.PrefetchScalarGridSpec(
            num_scalar_prefetch=0,
            grid=(grid,),
            in_specs=[
                pl.BlockSpec((br, _LANES), lambda i: (i, 0)),
                pl.BlockSpec((br, _LANES), lambda i: (i, 0)),
            ],
            out_specs=pl.BlockSpec((1, 2, _SUB, _LANES),
                                   lambda i: (i, 0, 0, 0)),
        ),
        compiler_params=pltpu.CompilerParams(
            dimension_semantics=("parallel",)),
    )(pred2, lab2)

    region_in = jnp.abs(jnp.sum(partials[:, 0]))
    region_out = jnp.abs(jnp.sum(partials[:, 1]))
    # `length` of the original module is identically zero (scalar min-max
    # normalization); kept explicit for clarity.
    length = jnp.float32(0.0)
    return jnp.float32(miu) * region_in + region_out + length


def acloss_reference(prediction, label, *, miu=1.0):
    """Pure-JAX reference mirroring the PyTorch forward exactly
    (including the Sobel conv / length path)."""
    prediction = prediction.astype(jnp.float32)
    label = label.astype(jnp.float32)
    C = prediction.shape[1]
    sx = jnp.array([[-1, 0, 1], [-2, 0, 2], [-1, 0, 1]], jnp.float32)
    sy = jnp.array([[-1, -2, -1], [0, 0, 0], [1, 2, 1]], jnp.float32)
    wx = jnp.tile(sx[None, None], (C, 1, 1, 1))
    wy = jnp.tile(sy[None, None], (C, 1, 1, 1))
    dn = ("NCHW", "OIHW", "NCHW")
    gx = lax.conv_general_dilated(prediction, wx, (1, 1), "SAME",
                                  feature_group_count=C, dimension_numbers=dn)
    gy = lax.conv_general_dilated(prediction, wy, (1, 1), "SAME",
                                  feature_group_count=C, dimension_numbers=dn)
    length = jnp.sum(jnp.abs(jnp.sqrt(gx ** 2 + gy ** 2 + 1e-8)))
    # scalar: min == max == itself  ->  0 / (0 + 1e-8) == 0
    length = (length - length) / ((length - length) + 1e-8)
    region_in = jnp.abs(jnp.sum(prediction * (label - 1.0) ** 2))
    region_out = jnp.abs(jnp.sum((1.0 - prediction) * label ** 2))
    return miu * region_in + region_out + length


if __name__ == "__main__":
    key = jax.random.PRNGKey(0)
    k1, k2 = jax.random.split(key)
    N, C, H, W = 2, 2, 16, 16          # classes=2 (module default)
    prediction = jax.random.uniform(k1, (N, C, H, W), dtype=jnp.float32)
    label = jax.random.bernoulli(k2, 0.5, (N, C, H, W)).astype(jnp.float32)

    loss = jax.block_until_ready(acloss_pallas(prediction, label, miu=1.0))
    ref = jax.block_until_ready(acloss_reference(prediction, label, miu=1.0))

    np.testing.assert_allclose(np.asarray(loss), np.asarray(ref),
                               rtol=1e-4, atol=1e-3)
    print("KERNEL_OK")
</pallas_src>

<mosaic_0001>
module attributes {stable_mosaic.version = 11 : i64} {
  func.func @_region_kernel(%arg0: i32, %arg1: memref<8x128xf32, #tpu.memory_space<vmem>>, %arg2: memref<8x128xf32, #tpu.memory_space<vmem>>, %arg3: memref<1x2x8x128xf32, #tpu.memory_space<vmem>>) attributes {dimension_semantics = [#tpu.dimension_semantics<parallel>], iteration_bounds = array<i64: 1>, scalar_prefetch = 0 : i64, scratch_operands = 0 : i64, tpu.core_type = #tpu.core_type<tc>, window_params = [{transform_indices = @transform_0, window_bounds = array<i64: 8, 128>}, {transform_indices = @transform_1, window_bounds = array<i64: 8, 128>}, {transform_indices = @transform_2, window_bounds = array<i64: 1, 2, 8, 128>}]} {
    %c0 = arith.constant 0 : index
    %c0_0 = arith.constant 0 : index
    %0 = vector.load %arg1[%c0, %c0_0] : memref<8x128xf32, #tpu.memory_space<vmem>>, vector<8x128xf32>
    %c0_1 = arith.constant 0 : index
    %c0_2 = arith.constant 0 : index
    %1 = vector.load %arg2[%c0_1, %c0_2] : memref<8x128xf32, #tpu.memory_space<vmem>>, vector<8x128xf32>
    %cst = arith.constant 1.000000e+00 : f32
    %2 = vector.broadcast %cst : f32 to vector<8x128xf32>
    %3 = arith.subf %1, %2 : vector<8x128xf32>
    %4 = arith.mulf %0, %3 : vector<8x128xf32>
    %5 = arith.mulf %4, %3 : vector<8x128xf32>
    %cst_3 = arith.constant 1.000000e+00 : f32
    %6 = vector.broadcast %cst_3 : f32 to vector<8x128xf32>
    %7 = arith.subf %6, %0 : vector<8x128xf32>
    %8 = arith.mulf %7, %1 : vector<8x128xf32>
    %9 = arith.mulf %8, %1 : vector<8x128xf32>
    %10 = vector.shape_cast %5 : vector<8x128xf32> to vector<1x8x128xf32>
    %cst_4 = arith.constant dense<0.000000e+00> : vector<8x128xf32>
    %11 = vector.multi_reduction <add>, %10, %cst_4 [0] : vector<1x8x128xf32> to vector<8x128xf32>
    %12 = vector.shape_cast %9 : vector<8x128xf32> to vector<1x8x128xf32>
    %cst_5 = arith.constant dense<0.000000e+00> : vector<8x128xf32>
    %13 = vector.multi_reduction <add>, %12, %cst_5 [0] : vector<1x8x128xf32> to vector<8x128xf32>
    %c0_6 = arith.constant 0 : index
    %c0_7 = arith.constant 0 : index
    %c0_8 = arith.constant 0 : index
    %c0_9 = arith.constant 0 : index
    %14 = vector.load %arg3[%c0_6, %c0_7, %c0_8, %c0_9] : memref<1x2x8x128xf32, #tpu.memory_space<vmem>>, vector<1x1x8x128xf32>
    %15 = vector.shape_cast %14 : vector<1x1x8x128xf32> to vector<8x128xf32>
    %16 = vector.shape_cast %11 : vector<8x128xf32> to vector<1x1x8x128xf32>
    tpu.vector_store %arg3[%c0_6, %c0_7, %c0_8, %c0_9], %16 {strides = array<i32>} : memref<1x2x8x128xf32, #tpu.memory_space<vmem>>, vector<1x1x8x128xf32>,
    %c0_10 = arith.constant 0 : index
    %c1 = arith.constant 1 : index
    %c0_11 = arith.constant 0 : index
    %c0_12 = arith.constant 0 : index
    %17 = vector.load %arg3[%c0_10, %c1, %c0_11, %c0_12] : memref<1x2x8x128xf32, #tpu.memory_space<vmem>>, vector<1x1x8x128xf32>
    %18 = vector.shape_cast %17 : vector<1x1x8x128xf32> to vector<8x128xf32>
    %19 = vector.shape_cast %13 : vector<8x128xf32> to vector<1x1x8x128xf32>
    tpu.vector_store %arg3[%c0_10, %c1, %c0_11, %c0_12], %19 {strides = array<i32>} : memref<1x2x8x128xf32, #tpu.memory_space<vmem>>, vector<1x1x8x128xf32>,
    return
  }
  func.func @transform_0(%arg0: i32) -> (i32, i32) {
    %c0_i32 = arith.constant 0 : i32
    %c0_i32_0 = arith.constant 0 : i32
    return %arg0, %c0_i32 : i32, i32
  }
  func.func @transform_1(%arg0: i32) -> (i32, i32) {
    %c0_i32 = arith.constant 0 : i32
    %c0_i32_0 = arith.constant 0 : i32
    return %arg0, %c0_i32 : i32, i32
  }
  func.func @transform_2(%arg0: i32) -> (i32, i32, i32, i32) {
    %c0_i32 = arith.constant 0 : i32
    %c0_i32_0 = arith.constant 0 : i32
    %c0_i32_1 = arith.constant 0 : i32
    %c0_i32_2 = arith.constant 0 : i32
    return %arg0, %c0_i32, %c0_i32_0, %c0_i32_1 : i32, i32, i32, i32
  }
}

</mosaic_0001>

<bundles_post_ra>
// kernel: acloss_pallas.1
= control target key start
LH: loop header
LB: loop body
LE: loop exit
PB: predicated region body
PF: predicated region fallthrough
CT: control target
= control target key end

     0   :  { %s57_s0 = inlined_call_operand.vmem [shape: f32[8,128], index: 0, kind: input, shape index: {}]   ;;  %s58_s1 = inlined_call_operand.vmem [shape: f32[8,128], index: 1, kind: input, shape index: {}]   ;;  %s59_s2 = inlined_call_operand.vmem [shape: f32[1,2,8,128], index: 2, kind: output, shape index: {}]  }
   0x1   :  { %v11_v0 = vld [vmem:[%s57_s0] sm:$0xff] }
   0x2   :  { %v12_v1 = vld [vmem:[%s58_s1] sm:$0xff]  ;;  %v16_v3 = vsub.f32 1.0, %v11_v0 }
   0x3   :  { %v28_v2 = vadd.f32 -1.0, %v12_v1 }
   0x4   :  { %v17_v5 = vmul.f32 %v16_v3, %v12_v1 }
   0x5   :  { %v14_v4 = vmul.f32 %v28_v2, %v11_v0 }
   0x6   :  { %v18_v7 = vmul.f32 %v17_v5, %v12_v1 }
   0x7   :  { %v15_v6 = vmul.f32 %v28_v2, %v14_v4 }
   0x8   :  { %29 = vst [vmem:[%s59_s2 + $0x8] sm:$0xff] %v18_v7 }
   0x9   :  { %21 = vst [vmem:[%s59_s2] sm:$0xff] %v15_v6 }

</bundles_post_ra>
